<compile_context>
chip_gen: v7x
topology: tpu7x:2x2x1
jax: 0.10.0
libtpu: 0.0.40
codegen_flags: <defaults>
</compile_context>

<pallas_src>
import functools
import math

import jax
import jax.numpy as jnp
from jax.experimental import pallas as pl
from jax.experimental.pallas import tpu as pltpu

NODE_DIM = 10
WEATHER_DIM = 3
FEAT_DIM = NODE_DIM + WEATHER_DIM  # 13
LANES = 128

_VMEM_BLOCK_BUDGET = 20 * 1024 * 1024   # target bytes for double-buffered blocks
_VMEM_LIMIT_BYTES = 48 * 1024 * 1024    # raised scoped-VMEM limit (fits all gens)


def _round_up(x, m):
    return ((x + m - 1) // m) * m


# ---------------------------------------------------------------------------
# Packed ("no feature slab") path
# ---------------------------------------------------------------------------
def _packed_kernel(k, locs_ref, prob_ref, cost_ref, twl_ref, twh_ref, maxt_ref,
                   dep_ref, wth_ref, w_ref, b_ref, o_ref):
    """One small matmul per source column against row-expanded weights.

    Each input block packs k logical rows per physical row; the expanded
    weight rows [f0*k, f1*k) route feature(s) f0..f1-1 of packed slot j to
    output lanes [j*E, (j+1)*E).  Accumulation stays in f32.
    """
    f32 = jnp.float32

    def term(x, f0, f1):
        return jnp.dot(x, w_ref[f0 * k:f1 * k, :], preferred_element_type=f32)

    cost = cost_ref[...]
    twl = twl_ref[...]
    twh = twh_ref[...]
    width = twh - twl                      # VPU; feature 6

    acc = term(locs_ref[...], 0, 2)        # locs x, y
    acc += term(prob_ref[...], 2, 3)       # attack_prob
    acc += term(cost, 3, 4)                # cost
    acc += term(twl, 4, 5)                 # tw_low
    acc += term(twh, 5, 6)                 # tw_high
    acc += term(width, 6, 7)               # tw_high - tw_low
    acc += term(maxt_ref[...], 7, 8)       # maxtime
    acc += term(cost / width, 8, 9)        # cost / width (inf/NaN preserved)
    acc += term(dep_ref[...], 9, 10)       # adj depot column
    acc += term(wth_ref[...], 10, 13)      # weather (3)

    o_ref[...] = (acc + b_ref[...]).astype(o_ref.dtype)


def _expand_weight(w_sub, k):
    """(g, E) -> (g*k, k*E) with big[j*g + t, j*E + e] = w_sub[t, e]."""
    g, e = w_sub.shape
    eye = jnp.eye(k, dtype=w_sub.dtype)
    return jnp.einsum("jl,te->jtle", eye, w_sub).reshape(g * k, k * e)


def _pg_packed_call(locs, prob, cost, twl, twh, maxt, depot, wbc, w, b, k, tm):
    M = prob.shape[0]
    E = w.shape[1]
    mr = M // k
    kE = k * E

    # Row-expanded weights, one group per original feature (width and
    # cost/width keep their own rows 6 and 8 — no folding, so every product
    # matches the reference bit-for-bit at MXU precision).
    groups = [(0, 2), (2, 3), (3, 4), (4, 5), (5, 6), (6, 7), (7, 8), (8, 9),
              (9, 10), (10, 13)]
    w_all = jnp.concatenate([_expand_weight(w[lo:hi, :], k) for lo, hi in groups],
                            axis=0)                       # (13k, kE)
    b_big = jnp.tile(b, (k,)).reshape(1, kE)

    # Free row-major packed views:  [M, g] -> [mr, g*k]  (M % k == 0 guaranteed).
    locs_p = locs.reshape(mr, 2 * k)
    prob_p = prob.reshape(mr, k)
    cost_p = cost.reshape(mr, k)
    twl_p = twl.reshape(mr, k)
    twh_p = twh.reshape(mr, k)
    maxt_p = maxt.reshape(mr, k)
    depot_p = depot.reshape(mr, k)
    wbc_p = wbc.reshape(mr, WEATHER_DIM * k)

    # Tile size: large enough to amortize the ~0.35us/step pipeline overhead,
    # clamped by a VMEM budget (each narrow input block is lane-padded to 128
    # in VMEM), and clamped to give >=2 grid steps for v7x megacore.
    n_in_blocks = 9
    per_packed_row = 2 * (n_in_blocks * LANES * 4 + kE * 4)
    tmr = max(8, min(tm // k, _VMEM_BLOCK_BUDGET // per_packed_row) // 8 * 8)
    tmr = min(tmr, max(8, _round_up(pl.cdiv(mr, 2), 8)))
    grid = (pl.cdiv(mr, tmr),)          # ragged last block handled by Pallas

    row = lambda i: (i, 0)
    fixed = lambda i: (0, 0)

    cost_est = pl.CostEstimate(
        flops=2 * mr * (FEAT_DIM * k) * kE,
        transcendentals=M,  # the in-kernel division
        bytes_accessed=M * (11 * 4 + E * 4) + w_all.size * 4 + kE * 4,
    )

    out_p = pl.pallas_call(
        functools.partial(_packed_kernel, k),
        out_shape=jax.ShapeDtypeStruct((mr, kE), jnp.float32),
        grid_spec=pltpu.PrefetchScalarGridSpec(
            num_scalar_prefetch=0,
            grid=grid,
            in_specs=[
                pl.BlockSpec((tmr, 2 * k), row),            # locs
                pl.BlockSpec((tmr, k), row),                # attack_prob
                pl.BlockSpec((tmr, k), row),                # cost
                pl.BlockSpec((tmr, k), row),                # tw_low
                pl.BlockSpec((tmr, k), row),                # tw_high
                pl.BlockSpec((tmr, k), row),                # maxtime
                pl.BlockSpec((tmr, k), row),                # depot column
                pl.BlockSpec((tmr, WEATHER_DIM * k), row),  # weather (bcast)
                pl.BlockSpec((FEAT_DIM * k, kE), fixed),    # expanded weight
                pl.BlockSpec((1, kE), fixed),               # tiled bias
            ],
            out_specs=pl.BlockSpec((tmr, kE), row),
        ),
        compiler_params=pltpu.CompilerParams(
            dimension_semantics=("parallel",),
            vmem_limit_bytes=_VMEM_LIMIT_BYTES,
        ),
        cost_estimate=cost_est,
    )(locs_p, prob_p, cost_p, twl_p, twh_p, maxt_p, depot_p, wbc_p, w_all, b_big)

    # Same row-major bytes: (mr, k*E) -> (M, E).  No padding rows, no copy.
    return out_p.reshape(M, E)


# ---------------------------------------------------------------------------
# Fallback path (packing not applicable): feature slab + single matmul
# ---------------------------------------------------------------------------
def _slab_kernel(x_ref, w_ref, b_ref, o_ref):
    acc = jnp.dot(x_ref[...], w_ref[...], preferred_element_type=jnp.float32)
    o_ref[...] = (acc + b_ref[...]).astype(o_ref.dtype)


def _pg_slab_call(locs, prob, cost, twl, twh, maxt, depot, wbc, w, b, tm):
    M = prob.shape[0]
    E = w.shape[1]
    width = twh - twl
    feat = jnp.concatenate(
        [locs,
         prob[:, None], cost[:, None], twl[:, None], twh[:, None],
         width[:, None], maxt[:, None], (cost / width)[:, None],
         depot[:, None], wbc],
        axis=-1,
    ).astype(jnp.float32)                    # [M, 13]

    m_arr = M
    if M < 8:                                # tiny-M guard: block must fit array
        m_arr = 8
        feat = jnp.pad(feat, ((0, m_arr - M), (0, 0)))

    per_row = 2 * (LANES * 4 + _round_up(E, LANES) * 4)
    tm_eff = max(8, min(tm, _VMEM_BLOCK_BUDGET // per_row) // 8 * 8)
    tm_eff = min(tm_eff, max(8, _round_up(pl.cdiv(m_arr, 2), 8)))
    grid = (pl.cdiv(m_arr, tm_eff),)

    cost_est = pl.CostEstimate(
        flops=2 * m_arr * FEAT_DIM * E,
        transcendentals=0,
        bytes_accessed=m_arr * (FEAT_DIM * 4 + E * 4) + FEAT_DIM * E * 4 + E * 4,
    )

    out = pl.pallas_call(
        _slab_kernel,
        out_shape=jax.ShapeDtypeStruct((m_arr, E), jnp.float32),
        grid_spec=pltpu.PrefetchScalarGridSpec(
            num_scalar_prefetch=0,
            grid=grid,
            in_specs=[
                pl.BlockSpec((tm_eff, FEAT_DIM), lambda i: (i, 0)),
                pl.BlockSpec((FEAT_DIM, E), lambda i: (0, 0)),
                pl.BlockSpec((1, E), lambda i: (0, 0)),
            ],
            out_specs=pl.BlockSpec((tm_eff, E), lambda i: (i, 0)),
        ),
        compiler_params=pltpu.CompilerParams(
            dimension_semantics=("parallel",),
            vmem_limit_bytes=_VMEM_LIMIT_BYTES,
        ),
        cost_estimate=cost_est,
    )(feat, w, b.reshape(1, E))
    return out[:M] if m_arr != M else out


# ---------------------------------------------------------------------------
# Public entry point
# ---------------------------------------------------------------------------
@functools.partial(jax.jit, static_argnames=("tm",))
def pg_init_embedding(td, weight, bias, *, tm=16384):
    """JAX/Pallas equivalent of pgInitEmbedding.forward.

    td:     dict with 'locs' [B,N,2], 'attack_prob' [B,N], 'cost' [B,N],
            'tw_low' [B,N], 'tw_high' [B,N], 'maxtime' [B,N], 'adj' [B,N,N],
            'weather' [B,3].
    weight: [13, E]   (transposed vs torch nn.Linear.weight)
    bias:   [E]
    tm:     target number of logical node-rows per grid step.
    returns [B, N, E]
    """
    f32 = jnp.float32
    B, N = td["cost"].shape
    M = B * N
    E = weight.shape[1]

    locs = td["locs"].astype(f32).reshape(M, 2)
    prob = td["attack_prob"].astype(f32).reshape(M)
    cost = td["cost"].astype(f32).reshape(M)
    twl = td["tw_low"].astype(f32).reshape(M)
    twh = td["tw_high"].astype(f32).reshape(M)
    maxt = td["maxtime"].astype(f32).reshape(M)
    depot = td["adj"][:, :, 0].astype(f32).reshape(M)          # see TODO above
    wbc = jnp.broadcast_to(td["weather"].astype(f32)[:, None, :],
                           (B, N, WEATHER_DIM)).reshape(M, WEATHER_DIM)

    w = weight.astype(f32)
    b = bias.astype(f32)

    # Lane-packing factor: k*E must be a multiple of 128 for dense stores,
    # k <= 8 (guard against tiny gcd(E,128)), and k must divide M so every
    # reshape is a free view.  Otherwise fall back to the slab path.
    k_pack = LANES // math.gcd(E, LANES)
    k = 0
    if k_pack <= 8 and M % k_pack == 0:
        k = k_pack
        while k < 8 and M % (2 * k) == 0:
            k *= 2
    use_packed = (k >= 2) and ((M // k) >= 8)

    if use_packed:
        out = _pg_packed_call(locs, prob, cost, twl, twh, maxt, depot, wbc,
                              w, b, k, tm)
    else:
        out = _pg_slab_call(locs, prob, cost, twl, twh, maxt, depot, wbc,
                            w, b, tm)
    return out.reshape(B, N, E)


# ---------------------------------------------------------------------------
# Test harness
# ---------------------------------------------------------------------------
def _init_linear_params(key, in_dim, out_dim):
    kw, kb = jax.random.split(key)
    bound = 1.0 / jnp.sqrt(jnp.float32(in_dim))
    weight = jax.random.uniform(kw, (in_dim, out_dim), minval=-bound,
                                maxval=bound, dtype=jnp.float32)
    bias = jax.random.uniform(kb, (out_dim,), minval=-bound, maxval=bound,
                              dtype=jnp.float32)
    return weight, bias


def _make_td(key, B, N):
    keys = jax.random.split(key, 8)
    locs = jax.random.uniform(keys[0], (B, N, 2), dtype=jnp.float32)
    attack_prob = jax.random.uniform(keys[1], (B, N), dtype=jnp.float32)
    cost = jax.random.uniform(keys[2], (B, N), dtype=jnp.float32) + 0.1
    tw_low = jax.random.uniform(keys[3], (B, N), dtype=jnp.float32)
    tw_high = tw_low + jax.random.uniform(keys[4], (B, N), minval=0.1,
                                          maxval=1.0, dtype=jnp.float32)
    maxtime = jax.random.uniform(keys[5], (B, N), minval=1.0, maxval=3.0,
                                 dtype=jnp.float32)
    adj = jax.random.uniform(keys[6], (B, N, N), dtype=jnp.float32)
    weather = jax.random.uniform(keys[7], (B, WEATHER_DIM), dtype=jnp.float32)
    return {"locs": locs, "attack_prob": attack_prob, "cost": cost,
            "tw_low": tw_low, "tw_high": tw_high, "maxtime": maxtime,
            "adj": adj, "weather": weather}


def _reference(td, weight, bias):
    B, N = td["cost"].shape
    feat = jnp.concatenate(
        [td["locs"],
         td["attack_prob"][..., None],
         td["cost"][..., None],
         td["tw_low"][..., None],
         td["tw_high"][..., None],
         (td["tw_high"] - td["tw_low"])[..., None],
         td["maxtime"][..., None],
         (td["cost"] / (td["tw_high"] - td["tw_low"]))[..., None],
         td["adj"][:, :, 0][..., None],
         jnp.broadcast_to(td["weather"][:, None, :], (B, N, WEATHER_DIM))],
        axis=-1,
    )
    return feat @ weight + bias


if __name__ == "__main__":
    key = jax.random.PRNGKey(0)
    k1, k2, k3, kp = jax.random.split(key, 4)

    E = 32
    weight, bias = _init_linear_params(kp, FEAT_DIM, E)

    # Test 1: module-spec small shape (M=16, tiny -> slab fallback path).
    td1 = _make_td(k1, 2, 8)
    out1 = jax.block_until_ready(pg_init_embedding(td1, weight, bias))
    ref1 = _reference(td1, weight, bias)
    assert out1.shape == (2, 8, E)
    assert jnp.allclose(out1, ref1, atol=1e-5, rtol=1e-5)

    # Test 2: M=100 (not a multiple of 8) -> packed path with k=4,
    # 2 grid steps with a ragged last block (OOB rows dropped).
    td2 = _make_td(k2, 2, 50)
    out2 = jax.block_until_ready(pg_init_embedding(td2, weight, bias))
    ref2 = _reference(td2, weight, bias)
    assert out2.shape == (2, 50, E)
    assert jnp.allclose(out2, ref2, atol=1e-5, rtol=1e-5)

    # Test 3: M=256 -> packed path with k=8 (fully lane-dense, 2 grid steps).
    td3 = _make_td(k3, 2, 128)
    out3 = jax.block_until_ready(pg_init_embedding(td3, weight, bias))
    ref3 = _reference(td3, weight, bias)
    assert out3.shape == (2, 128, E)
    assert jnp.allclose(out3, ref3, atol=1e-5, rtol=1e-5)

    print("KERNEL_OK")
</pallas_src>

<mosaic_0001>
module attributes {stable_mosaic.version = 11 : i64} {
  func.func @_slab_kernel(%arg0: i32, %arg1: memref<8x13xf32, #tpu.memory_space<vmem>>, %arg2: memref<13x32xf32, #tpu.memory_space<vmem>>, %arg3: memref<1x32xf32, #tpu.memory_space<vmem>>, %arg4: memref<8x32xf32, #tpu.memory_space<vmem>>) attributes {dimension_semantics = [#tpu.dimension_semantics<parallel>], iteration_bounds = array<i64: 2>, scalar_prefetch = 0 : i64, scratch_operands = 0 : i64, tpu.core_type = #tpu.core_type<tc>, window_params = [{transform_indices = @transform_0, window_bounds = array<i64: 8, 13>}, {pipeline_mode = #tpu.pipeline_mode<synchronous>, transform_indices = @transform_1, window_bounds = array<i64: 13, 32>}, {pipeline_mode = #tpu.pipeline_mode<synchronous>, transform_indices = @transform_2, window_bounds = array<i64: 1, 32>}, {transform_indices = @transform_3, window_bounds = array<i64: 8, 32>}]} {
    %c0 = arith.constant 0 : index
    %c0_0 = arith.constant 0 : index
    %0 = vector.load %arg1[%c0, %c0_0] : memref<8x13xf32, #tpu.memory_space<vmem>>, vector<8x13xf32>
    %c0_1 = arith.constant 0 : index
    %c0_2 = arith.constant 0 : index
    %1 = vector.load %arg2[%c0_1, %c0_2] : memref<13x32xf32, #tpu.memory_space<vmem>>, vector<13x32xf32>
    %cst = arith.constant dense<0.000000e+00> : vector<8x32xf32>
    %2 = tpu.matmul %0, %1, %cst {dimension_numbers = #tpu.dot_dimension_numbers<[1], [0], [0], [1], [0, 0, 1, 1], [], []>} : vector<8x13xf32>, vector<13x32xf32>, vector<8x32xf32> -> vector<8x32xf32>
    %c0_3 = arith.constant 0 : index
    %c0_4 = arith.constant 0 : index
    %3 = vector.load %arg3[%c0_3, %c0_4] : memref<1x32xf32, #tpu.memory_space<vmem>>, vector<1x32xf32>
    %4 = vector.broadcast %3 : vector<1x32xf32> to vector<8x32xf32>
    %5 = arith.addf %2, %4 : vector<8x32xf32>
    %c0_5 = arith.constant 0 : index
    %c0_6 = arith.constant 0 : index
    %6 = vector.load %arg4[%c0_5, %c0_6] : memref<8x32xf32, #tpu.memory_space<vmem>>, vector<8x32xf32>
    tpu.vector_store %arg4[%c0_5, %c0_6], %5 {strides = array<i32>} : memref<8x32xf32, #tpu.memory_space<vmem>>, vector<8x32xf32>,
    return
  }
  func.func @transform_0(%arg0: i32) -> (i32, i32) {
    %c0_i32 = arith.constant 0 : i32
    %c0_i32_0 = arith.constant 0 : i32
    return %arg0, %c0_i32 : i32, i32
  }
  func.func @transform_1(%arg0: i32) -> (i32, i32) {
    %c0_i32 = arith.constant 0 : i32
    %c0_i32_0 = arith.constant 0 : i32
    %c0_i32_1 = arith.constant 0 : i32
    return %c0_i32, %c0_i32_0 : i32, i32
  }
  func.func @transform_2(%arg0: i32) -> (i32, i32) {
    %c0_i32 = arith.constant 0 : i32
    %c0_i32_0 = arith.constant 0 : i32
    %c0_i32_1 = arith.constant 0 : i32
    return %c0_i32, %c0_i32_0 : i32, i32
  }
  func.func @transform_3(%arg0: i32) -> (i32, i32) {
    %c0_i32 = arith.constant 0 : i32
    %c0_i32_0 = arith.constant 0 : i32
    return %arg0, %c0_i32 : i32, i32
  }
}

</mosaic_0001>

<bundles_post_ra>
// kernel: sub.10
= control target key start
LH: loop header
LB: loop body
LE: loop exit
PB: predicated region body
PF: predicated region fallthrough
CT: control target
= control target key end

     0   :  { %s34_s0 = inlined_call_operand.vmem [shape: f32[16,1], index: 0, kind: input, shape index: {}]   ;;  %s35_s1 = inlined_call_operand.vmem [shape: f32[16,1], index: 1, kind: input, shape index: {}]   ;;  %s36_s2 = inlined_call_operand.vmem [shape: f32[16,1], index: 2, kind: output, shape index: {}]  }
   0x1   :  { %v3_v0 = vld [vmem:[%s34_s0] sm:$0x1] }
   0x2   :  { %v4_v1 = vld [vmem:[%s35_s1] sm:$0x1] }
   0x3   :  { %v7_v2 = vsub.f32 %v3_v0, %v4_v1 }
   0x5   :  { %9 = vst [vmem:[%s36_s2] sm:$0x1] %v7_v2 }

// kernel: div.7
= control target key start
LH: loop header
LB: loop body
LE: loop exit
PB: predicated region body
PF: predicated region fallthrough
CT: control target
= control target key end

     0   :  { %s62_s0 = inlined_call_operand.vmem [shape: f32[16,1], index: 0, kind: input, shape index: {}]   ;;  %s63_s1 = inlined_call_operand.vmem [shape: f32[16,1], index: 1, kind: input, shape index: {}]   ;;  %s64_s2 = inlined_call_operand.vmem [shape: f32[16,1], index: 2, kind: output, shape index: {}]  }
   0x1   :  { %v4_v0 = vld [vmem:[%s63_s1] sm:$0xff]  ;;  %v23_v1 = vld [vmem:[%s63_s1 + $0x8] sm:$0xff] }
   0x2   :  { %25 = vrcp.f32 %v4_v0  ;;  %v3_v2 = vld [vmem:[%s62_s0] sm:$0xff]  ;;  %v22_v3 = vld [vmem:[%s62_s0 + $0x8] sm:$0xff] }
   0x3   :  { %27 = vrcp.f32 %v23_v1 }
   0xc   :  { %v26_v4 = vpop.eup %25 }
   0xd   :  { %v28_v5 = vpop.eup %27  ;;  %v8_v6 = vmul.f32 %v26_v4, %v3_v2 }
   0xe   :  { %v18_v7 = vmul.f32 %v28_v5, %v22_v3 }
   0xf   :  { %10 = vst [vmem:[%s64_s2] sm:$0xff] %v8_v6 }
  0x10   :  { %24 = vst [vmem:[%s64_s2 + $0x8] sm:$0xff] %v18_v7 }

// kernel: pg_init_embedding.1
= control target key start
LH: loop header
LB: loop body
LE: loop exit
PB: predicated region body
PF: predicated region fallthrough
CT: control target
= control target key end

     0   :  { %8 = vsyncpa [#allocation3], 0  ;;  %s597_s0 = inlined_call_operand.vmem [shape: f32[16,13], index: 0, kind: input, shape index: {}]   ;;  %s598_s1 = inlined_call_operand.vmem [shape: f32[13,32], index: 1, kind: input, shape index: {}]   ;;  %s599_s2 = inlined_call_operand.vmem [shape: f32[1,32], index: 2, kind: input, shape index: {}]   ;;  %s600_s3 = inlined_call_operand.hbm [shape: f32[16,32], index: 3, kind: output, shape index: {}]  }
   0x1   :  { %10 = vsyncpa [#allocation3 + $0x1], 0  ;;  %s488_s12 = smov 0   ;;  %s490_s13 = smov 0  }
   0x2   :  { %s492_s14 = smov 0   ;;  %s494_s15 = smov 0  }
   0x3 LB: > { %s509_s16 = sadd.s32 4294967295, %s461_s15   ;;  %s329_s17 = sadd.s32 4294967294, %s461_s15   ;;  %s461_s15 = sphi %s494_s15, %s606_s15   ;;  %s457_s14 = sphi %s492_s14, %s605_s14   ;;  %s453_s13 = sphi %s490_s13, %s604_s13   ;;  %s449_s12 = sphi %s488_s12, %s603_s12  }
   0x4   : > { %s513_s18 = sadd.s32 1, %s461_s15   ;;  %s91_s19 = sadd.s32 1, %s457_s14 }
   0x5   : > { %s88_s20 = ssub.s32 %s461_s15, %s513_s18  ;;  %p101_p0 = scmp.ne.s32.totalorder %s457_s14, %s453_s13 }
   0x6   : > { %p89_p1 = scmp.eq.s32.totalorder %s88_s20, 0  ;;  %p102_p2 = scmp.eq.s32.totalorder %s509_s16, 1 }
   0x7   : > { %p107_p3 = scmp.ne.s32.totalorder %s453_s13, %s449_s12  ;;  %p108_p4 = scmp.eq.s32.totalorder %s329_s17, 1 }
   0x8   : > { %s524_s21 = scalar_select %p89_p1, %s457_s14, %s91_s19  }
   0x9   : > { %p526_p5 = por %p102_p2, %p101_p0  ;;  %p530_p6 = por %p108_p4, %p107_p3 }
   0xa   : > { %p332_p7 = scmp.ge.s32.totalorder %s461_s15, 1  ;;  %p139_p8 = scmp.lt.s32.totalorder %s461_s15, 3 }
   0xc   : > { %p140_p9 = pnand %p332_p7, %p139_p8 }
   0xd   : > { %v167_v0 = vld [vmem:[%s598_s1] sm:$0xff] (!%p140_p9)  ;;  %v168_v1 = vld [vmem:[%s598_s1 + $0x8] sm:$0x1f] (!%p140_p9)  ;;  %vm180_vm0 = vcmask (!%p140_p9), 1044480   ;;  %v463_v2 = vmov (!%p140_p9), 0.0|0.0   ;;  %vm464_vm1 = vmmov (!%p140_p9), 1  }
   0xe   : > { %143 = sbr.rel (%p140_p9) target bundleno = 254 (0xfe), region = 32  ;;  %352 = vmatprep.subr.bf16.mxu0 (!%p140_p9), %v463_v2  ;;  %v353_v3 = vpack.c.bf16 (!%p140_p9), %v168_v1, %v167_v0  ;;  %vm354_vm2 = vmpackc.low (!%p140_p9), %vm180_vm0, %vm464_vm1  ;;  %p162_p10 = scmp.lt.s32.totalorder (!%p140_p9), %s509_s16, 1  ;;  %vm465_vm3 = vmmov (!%p140_p9), 0   ;;  %v466_v4 = vmov (!%p140_p9), 0.0   ;;  %vm176_vm4 = vcmask (!%p140_p9), 105472  }
   0xf   : > { %349 = vmatprep.mubr.msk.f32.mxu0 (!%p140_p9), %vm465_vm3, %v466_v4  ;;  %s159_s6 = sand.u32 (!%p140_p9), 1, %s453_s13   ;;  %v335_v6 = vld [vmem:[%s599_s2] ss:$0 sm:$0xff] (!%p140_p9)  ;;  %s339_s10 = sshll.u32 (!%p140_p9), %s509_s16, 7  ;;  %vm254_vm5 = vcmask (!%p140_p9), 261120  }
  0x10   : > { %355 = vmatpush3.bf16.msk.msra.mxu0 (!%p140_p9), %vm354_vm2, %v353_v3  ;;  %s333_s7 = sshll.u32 (!%p140_p9), %s159_s6, 3  ;;  %s555_s24 = scalar_lea.hbm (!%p140_p9), %s600_s3, %s339_s10 }
  0x11   : > { %s161_s11 = scalar_lea.vmem (!%p140_p9), [#allocation2], %s333_s7  ;;  %s257_s25 = scalar_lea.sflag (!%p140_p9), [#allocation3], %s159_s6 }
  0x12   : > { %s270_s17 = sshll.u32 (!%p140_p9), %s161_s11, 4  ;;  %s557_s17 = int_to_ptr.vmem [resolvable:$true] %s270_s17 }
  0x13   : > { %s399_s26 = scalar_lea.vmem (!%p140_p9), %s557_s17, 128 }
  0x14   : > { %p400_p11 = scmp.ne.s32.totalorder (!%p140_p9), %s557_s17, %s399_s26 }
  0x15   : > { %s163_s28 = scalar_select %p162_p10, %s509_s16, 1 }
  0x16   : > { %p401_p12 = pnand %p400_p11, %p526_p5  ;;  %s467_s16 = smov [#allocation2]  }
  0x17   : > { %s334_s29 = sshll.u32 %s163_s28, 3  ;;  %s403_s27 = sshll.u32 %s467_s16, 4  ;;  %s404_s27 = int_to_ptr.vmem [resolvable:$false] %s403_s27 }
  0x18   : > { %s165_s5 = scalar_lea.vmem %s597_s0, %s334_s29  ;;  %p402_p13 = pneg %p401_p12 }
  0x19   : > { %v166_v5 = vld [vmem:[%s165_s5] sm:$0xff]  ;;  %s405_s28 = scalar_lea.vmem %s404_s27, 256  ;;  %p406_p0 = scmp.lt.s32.totalorder %s557_s17, %s404_s27 }
  0x1a   : > { %350 = vmatmul.mubr.msk.f32.vlgmr.msra.gmra.mrb[0].mxu0 %vm176_vm4, %v166_v5  ;;  %p407_p1 = scmp.lt.s32.totalorder %s405_s28, %s399_s26 }
  0x1c   : > { %p408_p2 = por %p407_p1, %p406_p0 }
  0x1e   : > { %p409_p3 = pnand %p408_p2, %p402_p13 }
  0xed   : > { %v250_v7 = vpop.f32.mrb[0].mxu0 }
  0xee   : > { %v251_v8 = vadd.f32 %v335_v6, %v250_v7  ;;  %v351_v9 = vpop.f32.mrb[1].mxu0 }
  0xf0   : > { %255 = vst.msk [vmem:[%s161_s11] sm:$0xff] %vm254_vm5, %v251_v8 }
  0xf1   : > { %412 = shalt.err (!%p409_p3)
}
  0xf2   : > { %s413_s29 = scalar_lea.hbm %s555_s24, 128  ;;  %s417_s5 = scalar_lea.hbm %s600_s3, 256 }
  0xf3   : > { %p414_p4 = scmp.ne.s32.totalorder %s555_s24, %s413_s29  ;;  %p418_p9 = scmp.lt.u32.totalorder %s555_s24, %s600_s3 }
  0xf4   : > { %p419_p10 = scmp.lt.u32.totalorder %s417_s5, %s413_s29  ;;  %p421_p12 = scmp.lt.u32.totalorder %s413_s29, %s555_s24 }
  0xf5   : > { %p415_p7 = pnand %p414_p4, %p526_p5 }
  0xf6   : > { %p420_p11 = por %p419_p10, %p418_p9 }
  0xf7   : > { %p416_p8 = pneg %p415_p7 }
  0xf8   : > { %p422_p13 = por %p421_p12, %p420_p11 }
  0xfa   : > { %p423_p0 = pnand %p422_p13, %p416_p8 }
  0xfc   : > { %426 = shalt.err (!%p423_p0)
}
  0xfd   : > { %356 = dma.vmem_to_hbm [thread:$0]  (%p526_p5), %s557_s17, 128, %s555_s24, %s257_s25  }
  0xfe PF: > { %p362_p1 = scmp.ge.s32.totalorder %s461_s15, 2  ;;  %s282_s8 = sand.u32 1, %s449_s12  }
  0xff   : > { %s283_s9 = scalar_lea.sflag [#allocation3], %s282_s8 }
 0x100   : > { %p359_p2 = pnand %p362_p1, %p530_p6 }
 0x102   : > { %444 = dma.done.wait (!%p359_p2), %s283_s9, 128  }
 0x103   : > { %446 = vsyncadd (!%p359_p2), %s283_s9, 4294967168  ;;  %p13_p3 = scmp.ge.s32.totalorder %s513_s18, 4   ;;  %s603_s12 = smov %s453_s13 }
 0x104   : > { %s604_s13 = smov %s457_s14  ;;  %s605_s14 = smov %s524_s21 }
 0x105   : > { %s606_s15 = smov %s513_s18  ;;  %15 = sbr.rel (!%p13_p3) target bundleno = 3 (0x3), region = 67 }
 0x10c   :  { %288 = vsyncpa [#allocation3], 1 }
 0x10d   :  { %290 = vsyncpa [#allocation3 + $0x1], 1 }

</bundles_post_ra>
